<compile_context>
chip_gen: v7x
topology: tpu7x:2x2x1
jax: 0.10.0
libtpu: 0.0.40
codegen_flags: <defaults>
</compile_context>

<pallas_src>
import math
import jax
import jax.numpy as jnp
from jax.experimental import pallas as pl
from jax.experimental.pallas import tpu as pltpu


# ----------------------------- small helpers ---------------------------------

def _round_up(x, m):
    return ((x + m - 1) // m) * m


def _erf(x):
    # Abramowitz & Stegun 7.1.26 polynomial erf (|err| < 1.5e-7).
    # exp() goes to the EUP slot; the Horner chain is cheap VALU filler.
    a1, a2, a3, a4, a5 = (0.254829592, -0.284496736, 1.421413741,
                          -1.453152027, 1.061405429)
    p = 0.3275911
    z = jnp.abs(x)
    t = 1.0 / (1.0 + p * z)
    poly = ((((a5 * t + a4) * t + a3) * t + a2) * t + a1) * t
    r = 1.0 - poly * jnp.exp(-z * z)
    return jnp.where(x >= 0, r, -r)       # single select instead of sign*|x|


def _gelu_exact(x):
    # torch.nn.functional.gelu default = exact (erf-based) GELU.
    return 0.5 * x * (1.0 + _erf(x * (1.0 / math.sqrt(2.0))))


# --------------------------------- kernel ------------------------------------
# Grid = (M_pad // tm, pf_pad // tf); axis 1 is a reduction over pf chunks.
#   h_chunk = gelu( x_tile @ W1[:, chunk] + b1[chunk] )      (tm, tf)  f32
#   acc    += h_chunk.bf16 @ W2[chunk, :]                    (tm, H)   f32
# On the last chunk: add b2, cast, write the lane-dense (tm, H) output tile.

def _ffn_kernel(x_ref, w1_ref, b1_ref, w2_ref, b2_ref, o_ref, *scratch):
    # Accumulate directly into the resident output block when it is f32;
    # otherwise use the explicit f32 VMEM scratch (last positional ref).
    acc_ref = scratch[0] if scratch else o_ref
    j = pl.program_id(1)

    @pl.when(j == 0)
    def _():
        acc_ref[...] = jnp.zeros_like(acc_ref)

    # In-kernel bf16 cast of the activation tile (hidden under the MXU) instead
    # of a separate wrapper-side XLA pass over x.
    xb = x_ref[...].astype(jnp.bfloat16)
    h = jnp.dot(xb, w1_ref[...], preferred_element_type=jnp.float32)
    h = _gelu_exact(h + b1_ref[...])
    # TODO(synk): nn.Dropout treated as identity (eval-mode forward only).
    acc_ref[...] += jnp.dot(h.astype(jnp.bfloat16), w2_ref[...],
                            preferred_element_type=jnp.float32)

    @pl.when(j == pl.num_programs(1) - 1)
    def _():
        o_ref[...] = (acc_ref[...] + b2_ref[...]).astype(o_ref.dtype)


# ----------------------------- tiling / budgeting ----------------------------

def _vmem_capacity_bytes():
    try:
        return int(pltpu.get_tpu_info().vmem_capacity_bytes)
    except Exception:
        return 64 * 1024 * 1024       # conservative (v7x per-TC VMEM)


def _tile_footprint_bytes(tm, tf, H_pad, x_bytes, out_bytes, need_scratch):
    f = 0
    f += 2 * tm * H_pad * x_bytes      # x blocks (double buffered)
    f += 2 * H_pad * tf * 2            # W1 bf16 blocks
    f += 2 * tf * H_pad * 2            # W2 bf16 blocks
    f += 2 * tm * H_pad * out_bytes    # output blocks
    f += 2 * max(tf, 128) * 4 + 2 * max(H_pad, 128) * 4   # biases
    if need_scratch:
        f += tm * H_pad * 4            # f32 accumulator scratch
    return f


# --------------------------------- wrapper ------------------------------------

def positionwise_feedforward(x, W1, b1, W2, b2):
    """Fused y = fc_2(gelu(fc_1(x))), dropout = identity.

    x: (..., H);  W1: (H, pf);  b1: (pf,);  W2: (pf, H);  b2: (H,).
    Returns the same dtype and shape as x.
    """
    orig_shape = x.shape
    H = int(orig_shape[-1])
    pf = int(W1.shape[-1])
    M = 1
    for d in orig_shape[:-1]:
        M *= int(d)

    out_dtype = x.dtype
    x_bytes = jnp.dtype(x.dtype).itemsize
    out_bytes = jnp.dtype(out_dtype).itemsize
    need_scratch = out_dtype != jnp.float32

    # Generation-aware VMEM budget (v5e/v6e: 128 MiB, v7x: 64 MiB).
    cap = _vmem_capacity_bytes()
    budget = int(cap * 0.7)
    tm_max = 512 if cap >= (96 << 20) else 256

    # Lane-dense padding of the contraction / output dims.
    H_pad = _round_up(H, 128)
    pf_pad = _round_up(pf, 128)

    # Row tile: multiple of 16 (bf16 sublane packing), capped by tm_max.
    tm = min(tm_max, _round_up(M, 16))

    # Prefer fully resident weights (tf == pf_pad): the W1/W2 block indices are
    # then constant, so Pallas DMAs the weights once for the whole grid.
    tf = pf_pad
    if _tile_footprint_bytes(tm, tf, H_pad, x_bytes, out_bytes, need_scratch) > budget:
        for cand in (1024, 512, 256, 128):
            tf = cand
            if _tile_footprint_bytes(tm, tf, H_pad, x_bytes, out_bytes,
                                     need_scratch) <= budget:
                break
    while (_tile_footprint_bytes(tm, tf, H_pad, x_bytes, out_bytes,
                                 need_scratch) > budget and tm > 16):
        tm = max(16, _round_up(tm // 2, 16))
    # TODO(synk): for extremely large H (>= 8k on v7x) an additional H grid axis
    # would be needed; not required for these configurations.
    tf = min(tf, pf_pad)
    pf_pad = _round_up(pf, tf)          # tf chunks tile pf exactly
    M_pad = _round_up(M, tm)

    # ---- operand preparation (pad only when needed) ----
    x2 = x.reshape(M, H)
    if M_pad != M or H_pad != H:
        x2 = jnp.pad(x2, ((0, M_pad - M), (0, H_pad - H)))

    # bf16 MXU weight operands; in a real model these casts/pads should be done
    # once at parameter-load time and cached rather than per call.
    w1b = W1.astype(jnp.bfloat16)
    w2b = W2.astype(jnp.bfloat16)
    b1f = b1.reshape(1, pf).astype(jnp.float32)
    b2f = b2.reshape(1, H).astype(jnp.float32)
    if H_pad != H or pf_pad != pf:
        w1b = jnp.pad(w1b, ((0, H_pad - H), (0, pf_pad - pf)))
        w2b = jnp.pad(w2b, ((0, pf_pad - pf), (0, H_pad - H)))
        b1f = jnp.pad(b1f, ((0, 0), (0, pf_pad - pf)))
        b2f = jnp.pad(b2f, ((0, 0), (0, H_pad - H)))

    grid = (M_pad // tm, pf_pad // tf)
    scratch_shapes = ([pltpu.VMEM((tm, H_pad), jnp.float32)]
                      if need_scratch else [])

    footprint = _tile_footprint_bytes(tm, tf, H_pad, x_bytes, out_bytes,
                                      need_scratch)
    vmem_limit = int(min(cap * 0.9,
                         max(footprint * 1.3 + (2 << 20), 32 << 20)))

    out = pl.pallas_call(
        _ffn_kernel,
        out_shape=jax.ShapeDtypeStruct((M_pad, H_pad), out_dtype),
        grid_spec=pltpu.PrefetchScalarGridSpec(
            num_scalar_prefetch=0,
            grid=grid,
            in_specs=[
                pl.BlockSpec((tm, H_pad), lambda i, j: (i, 0)),   # x rows
                pl.BlockSpec((H_pad, tf), lambda i, j: (0, j)),   # W1 pf-chunk
                pl.BlockSpec((1, tf), lambda i, j: (0, j)),       # b1 pf-chunk
                pl.BlockSpec((tf, H_pad), lambda i, j: (j, 0)),   # W2 pf-chunk
                pl.BlockSpec((1, H_pad), lambda i, j: (0, 0)),    # b2
            ],
            out_specs=pl.BlockSpec((tm, H_pad), lambda i, j: (i, 0)),
            scratch_shapes=scratch_shapes,
        ),
        compiler_params=pltpu.CompilerParams(
            dimension_semantics=("parallel", "arbitrary"),
            vmem_limit_bytes=vmem_limit),
    )(x2, w1b, b1f, w2b, b2f)

    if M_pad != M or H_pad != H:
        out = out[:M, :H]
    return out.reshape(orig_shape)


# ----------------------------------- demo --------------------------------------

if __name__ == "__main__":
    B, S, H, pf_dim = 2, 8, 32, 64

    key = jax.random.PRNGKey(0)
    kx, k1, k2, k3, k4 = jax.random.split(key, 5)
    x = jax.random.normal(kx, (B, S, H), jnp.float32)

    # nn.Linear default init (uniform in +-1/sqrt(fan_in)).
    bound1 = 1.0 / math.sqrt(H)
    W1 = jax.random.uniform(k1, (H, pf_dim), jnp.float32, -bound1, bound1)
    b1 = jax.random.uniform(k2, (pf_dim,), jnp.float32, -bound1, bound1)
    bound2 = 1.0 / math.sqrt(pf_dim)
    W2 = jax.random.uniform(k3, (pf_dim, H), jnp.float32, -bound2, bound2)
    b2 = jax.random.uniform(k4, (H,), jnp.float32, -bound2, bound2)

    out = positionwise_feedforward(x, W1, b1, W2, b2)
    out = jax.block_until_ready(out)

    # Pure-JAX reference (f32, exact erf GELU, dropout = identity).
    ref = jnp.dot(jax.nn.gelu(jnp.dot(x, W1) + b1, approximate=False), W2) + b2

    assert out.shape == (B, S, H), out.shape
    assert out.dtype == x.dtype, out.dtype
    assert bool(jnp.all(jnp.isfinite(out)))
    max_err = float(jnp.max(jnp.abs(out - ref)))
    # bf16 MXU operands + polynomial erf => loose tolerance is a deliberate
    # precision tradeoff, not exact f32 parity.
    assert bool(jnp.allclose(out, ref, atol=3e-2, rtol=3e-2)), max_err
    print("KERNEL_OK")
</pallas_src>

<mosaic_0001>
module attributes {stable_mosaic.version = 11 : i64} {
  func.func @_ffn_kernel(%arg0: i32, %arg1: i32, %arg2: memref<16x128xf32, #tpu.memory_space<vmem>>, %arg3: memref<128x128xbf16, #tpu.memory_space<vmem>>, %arg4: memref<1x128xf32, #tpu.memory_space<vmem>>, %arg5: memref<128x128xbf16, #tpu.memory_space<vmem>>, %arg6: memref<1x128xf32, #tpu.memory_space<vmem>>, %arg7: memref<16x128xf32, #tpu.memory_space<vmem>>) attributes {dimension_semantics = [#tpu.dimension_semantics<parallel>, #tpu.dimension_semantics<arbitrary>], iteration_bounds = array<i64: 1, 1>, scalar_prefetch = 0 : i64, scratch_operands = 0 : i64, tpu.core_type = #tpu.core_type<tc>, window_params = [{transform_indices = @transform_0, window_bounds = array<i64: 16, 128>}, {transform_indices = @transform_1, window_bounds = array<i64: 128, 128>}, {transform_indices = @transform_2, window_bounds = array<i64: 1, 128>}, {transform_indices = @transform_3, window_bounds = array<i64: 128, 128>}, {pipeline_mode = #tpu.pipeline_mode<synchronous>, transform_indices = @transform_4, window_bounds = array<i64: 1, 128>}, {transform_indices = @transform_5, window_bounds = array<i64: 16, 128>}]} {
    %c0_i32 = arith.constant 0 : i32
    %0 = arith.cmpi eq, %arg1, %c0_i32 : i32
    %1 = arith.extui %0 : i1 to i32
    %c0_i32_0 = arith.constant 0 : i32
    %2 = arith.cmpi ne, %1, %c0_i32_0 : i32
    scf.if %2 {
      %cst_30 = arith.constant 0.000000e+00 : f32
      %59 = vector.broadcast %cst_30 : f32 to vector<16x128xf32>
      %c0_31 = arith.constant 0 : index
      %c0_32 = arith.constant 0 : index
      %60 = vector.load %arg7[%c0_31, %c0_32] : memref<16x128xf32, #tpu.memory_space<vmem>>, vector<16x128xf32>
      tpu.vector_store %arg7[%c0_31, %c0_32], %59 {strides = array<i32>} : memref<16x128xf32, #tpu.memory_space<vmem>>, vector<16x128xf32>,
    } else {
    }
    %c0 = arith.constant 0 : index
    %c0_1 = arith.constant 0 : index
    %3 = vector.load %arg2[%c0, %c0_1] : memref<16x128xf32, #tpu.memory_space<vmem>>, vector<16x128xf32>
    %4 = arith.truncf %3 : vector<16x128xf32> to vector<16x128xbf16>
    %c0_2 = arith.constant 0 : index
    %c0_3 = arith.constant 0 : index
    %5 = vector.load %arg3[%c0_2, %c0_3] : memref<128x128xbf16, #tpu.memory_space<vmem>>, vector<128x128xbf16>
    %cst = arith.constant dense<0.000000e+00> : vector<16x128xf32>
    %6 = tpu.matmul %4, %5, %cst {dimension_numbers = #tpu.dot_dimension_numbers<[1], [0], [0], [1], [0, 0, 1, 1], [], []>} : vector<16x128xbf16>, vector<128x128xbf16>, vector<16x128xf32> -> vector<16x128xf32>
    %c0_4 = arith.constant 0 : index
    %c0_5 = arith.constant 0 : index
    %7 = vector.load %arg4[%c0_4, %c0_5] : memref<1x128xf32, #tpu.memory_space<vmem>>, vector<1x128xf32>
    %8 = vector.broadcast %7 : vector<1x128xf32> to vector<16x128xf32>
    %9 = arith.addf %6, %8 : vector<16x128xf32>
    %cst_6 = arith.constant 5.000000e-01 : f32
    %10 = vector.broadcast %cst_6 : f32 to vector<16x128xf32>
    %11 = arith.mulf %10, %9 : vector<16x128xf32>
    %cst_7 = arith.constant 0.707106769 : f32
    %12 = vector.broadcast %cst_7 : f32 to vector<16x128xf32>
    %13 = arith.mulf %9, %12 : vector<16x128xf32>
    %14 = math.absf %13 : vector<16x128xf32>
    %cst_8 = arith.constant 0.327591091 : f32
    %15 = vector.broadcast %cst_8 : f32 to vector<16x128xf32>
    %16 = arith.mulf %15, %14 : vector<16x128xf32>
    %cst_9 = arith.constant 1.000000e+00 : f32
    %17 = vector.broadcast %cst_9 : f32 to vector<16x128xf32>
    %18 = arith.addf %17, %16 : vector<16x128xf32>
    %cst_10 = arith.constant 1.000000e+00 : f32
    %19 = vector.broadcast %cst_10 : f32 to vector<16x128xf32>
    %20 = arith.divf %19, %18 : vector<16x128xf32>
    %cst_11 = arith.constant 1.06140542 : f32
    %21 = vector.broadcast %cst_11 : f32 to vector<16x128xf32>
    %22 = arith.mulf %21, %20 : vector<16x128xf32>
    %cst_12 = arith.constant -1.45315206 : f32
    %23 = vector.broadcast %cst_12 : f32 to vector<16x128xf32>
    %24 = arith.addf %22, %23 : vector<16x128xf32>
    %25 = arith.mulf %24, %20 : vector<16x128xf32>
    %cst_13 = arith.constant 1.42141378 : f32
    %26 = vector.broadcast %cst_13 : f32 to vector<16x128xf32>
    %27 = arith.addf %25, %26 : vector<16x128xf32>
    %28 = arith.mulf %27, %20 : vector<16x128xf32>
    %cst_14 = arith.constant -0.284496725 : f32
    %29 = vector.broadcast %cst_14 : f32 to vector<16x128xf32>
    %30 = arith.addf %28, %29 : vector<16x128xf32>
    %31 = arith.mulf %30, %20 : vector<16x128xf32>
    %cst_15 = arith.constant 0.254829586 : f32
    %32 = vector.broadcast %cst_15 : f32 to vector<16x128xf32>
    %33 = arith.addf %31, %32 : vector<16x128xf32>
    %34 = arith.mulf %33, %20 : vector<16x128xf32>
    %cst_16 = arith.constant 0.000000e+00 : f32
    %35 = vector.broadcast %cst_16 : f32 to vector<16x128xf32>
    %36 = arith.subf %35, %14 : vector<16x128xf32>
    %37 = arith.mulf %36, %14 : vector<16x128xf32>
    %38 = math.exp %37 : vector<16x128xf32>
    %39 = arith.mulf %34, %38 : vector<16x128xf32>
    %cst_17 = arith.constant 1.000000e+00 : f32
    %40 = vector.broadcast %cst_17 : f32 to vector<16x128xf32>
    %41 = arith.subf %40, %39 : vector<16x128xf32>
    %cst_18 = arith.constant 0.000000e+00 : f32
    %42 = vector.broadcast %cst_18 : f32 to vector<16x128xf32>
    %43 = arith.cmpf oge, %13, %42 : vector<16x128xf32>
    %cst_19 = arith.constant 0.000000e+00 : f32
    %44 = vector.broadcast %cst_19 : f32 to vector<16x128xf32>
    %45 = arith.subf %44, %41 : vector<16x128xf32>
    %46 = arith.select %43, %41, %45 : vector<16x128xi1>, vector<16x128xf32>
    %cst_20 = arith.constant 1.000000e+00 : f32
    %47 = vector.broadcast %cst_20 : f32 to vector<16x128xf32>
    %48 = arith.addf %47, %46 : vector<16x128xf32>
    %49 = arith.mulf %11, %48 : vector<16x128xf32>
    %c0_21 = arith.constant 0 : index
    %c0_22 = arith.constant 0 : index
    %50 = vector.load %arg7[%c0_21, %c0_22] : memref<16x128xf32, #tpu.memory_space<vmem>>, vector<16x128xf32>
    %51 = arith.truncf %49 : vector<16x128xf32> to vector<16x128xbf16>
    %c0_23 = arith.constant 0 : index
    %c0_24 = arith.constant 0 : index
    %52 = vector.load %arg5[%c0_23, %c0_24] : memref<128x128xbf16, #tpu.memory_space<vmem>>, vector<128x128xbf16>
    %cst_25 = arith.constant dense<0.000000e+00> : vector<16x128xf32>
    %53 = tpu.matmul %51, %52, %cst_25 {dimension_numbers = #tpu.dot_dimension_numbers<[1], [0], [0], [1], [0, 0, 1, 1], [], []>} : vector<16x128xbf16>, vector<128x128xbf16>, vector<16x128xf32> -> vector<16x128xf32>
    %54 = arith.addf %50, %53 : vector<16x128xf32>
    %c0_26 = arith.constant 0 : index
    %c0_27 = arith.constant 0 : index
    %55 = vector.load %arg7[%c0_26, %c0_27] : memref<16x128xf32, #tpu.memory_space<vmem>>, vector<16x128xf32>
    tpu.vector_store %arg7[%c0_26, %c0_27], %54 {strides = array<i32>} : memref<16x128xf32, #tpu.memory_space<vmem>>, vector<16x128xf32>,
    %c0_i32_28 = arith.constant 0 : i32
    %56 = arith.cmpi eq, %arg1, %c0_i32_28 : i32
    %57 = arith.extui %56 : i1 to i32
    %c0_i32_29 = arith.constant 0 : i32
    %58 = arith.cmpi ne, %57, %c0_i32_29 : i32
    scf.if %58 {
      %c0_30 = arith.constant 0 : index
      %c0_31 = arith.constant 0 : index
      %59 = vector.load %arg7[%c0_30, %c0_31] : memref<16x128xf32, #tpu.memory_space<vmem>>, vector<16x128xf32>
      %c0_32 = arith.constant 0 : index
      %c0_33 = arith.constant 0 : index
      %60 = vector.load %arg6[%c0_32, %c0_33] : memref<1x128xf32, #tpu.memory_space<vmem>>, vector<1x128xf32>
      %61 = vector.broadcast %60 : vector<1x128xf32> to vector<16x128xf32>
      %62 = arith.addf %59, %61 : vector<16x128xf32>
      %c0_34 = arith.constant 0 : index
      %c0_35 = arith.constant 0 : index
      %63 = vector.load %arg7[%c0_34, %c0_35] : memref<16x128xf32, #tpu.memory_space<vmem>>, vector<16x128xf32>
      tpu.vector_store %arg7[%c0_34, %c0_35], %62 {strides = array<i32>} : memref<16x128xf32, #tpu.memory_space<vmem>>, vector<16x128xf32>,
    } else {
    }
    return
  }
  func.func @transform_0(%arg0: i32, %arg1: i32) -> (i32, i32) {
    %c0_i32 = arith.constant 0 : i32
    %c0_i32_0 = arith.constant 0 : i32
    return %arg0, %c0_i32 : i32, i32
  }
  func.func @transform_1(%arg0: i32, %arg1: i32) -> (i32, i32) {
    %c0_i32 = arith.constant 0 : i32
    %c0_i32_0 = arith.constant 0 : i32
    return %c0_i32, %arg1 : i32, i32
  }
  func.func @transform_2(%arg0: i32, %arg1: i32) -> (i32, i32) {
    %c0_i32 = arith.constant 0 : i32
    %c0_i32_0 = arith.constant 0 : i32
    return %c0_i32, %arg1 : i32, i32
  }
  func.func @transform_3(%arg0: i32, %arg1: i32) -> (i32, i32) {
    %c0_i32 = arith.constant 0 : i32
    %c0_i32_0 = arith.constant 0 : i32
    return %arg1, %c0_i32 : i32, i32
  }
  func.func @transform_4(%arg0: i32, %arg1: i32) -> (i32, i32) {
    %c0_i32 = arith.constant 0 : i32
    %c0_i32_0 = arith.constant 0 : i32
    %c0_i32_1 = arith.constant 0 : i32
    return %c0_i32, %c0_i32_0 : i32, i32
  }
  func.func @transform_5(%arg0: i32, %arg1: i32) -> (i32, i32) {
    %c0_i32 = arith.constant 0 : i32
    %c0_i32_0 = arith.constant 0 : i32
    return %arg0, %c0_i32 : i32, i32
  }
}

</mosaic_0001>

<bundles_post_ra>
// kernel: tpu_custom_call.1
= control target key start
LH: loop header
LB: loop body
LE: loop exit
PB: predicated region body
PF: predicated region fallthrough
CT: control target
= control target key end

     0   :  { %10 = vsyncpa [#allocation3], 0  ;;  %s694_s0 = inlined_call_operand.hbm [shape: f32[16,128], index: 0, kind: input, shape index: {}]   ;;  %s695_s1 = inlined_call_operand.hbm [shape: bf16[128,128], index: 1, kind: input, shape index: {}]   ;;  %s696_s2 = inlined_call_operand.vmem [shape: f32[1,128], index: 2, kind: input, shape index: {}]   ;;  %s697_s3 = inlined_call_operand.hbm [shape: bf16[128,128], index: 3, kind: input, shape index: {}]   ;;  %s698_s4 = inlined_call_operand.vmem [shape: f32[1,128], index: 4, kind: input, shape index: {}]   ;;  %s699_s5 = inlined_call_operand.hbm [shape: f32[16,128], index: 5, kind: output, shape index: {}]  }
   0x1   :  { %11 = vsyncpa [#allocation6], 0 }
   0x2   :  { %12 = vsyncpa [#allocation4], 0  ;;  %s588_s18 = smov [#allocation5]   ;;  %s494_s22 = scalar_lea.hbm %s695_s1, 1024 }
   0x3   :  { %s30_s19 = sshll.u32 %s588_s18, 4  ;;  %p495_p0 = scmp.ne.s32.totalorder %s695_s1, %s494_s22  ;;  %s31_s19 = int_to_ptr.vmem [resolvable:$true] %s30_s19 }
   0x4   :  { %p498_p1 = scmp.lt.u32.totalorder %s494_s22, %s695_s1 }
   0x6   :  { %p500_p2 = pnand %p498_p1, %p495_p0 }
   0x8   :  { %503 = shalt.err (!%p500_p2)
}
   0x9   :  { %s504_s27 = scalar_lea.vmem %s31_s19, 1024  ;;  %p509_p4 = scmp.lt.s32.totalorder %s31_s19, %s31_s19 }
   0xa   :  { %p505_p3 = scmp.ne.s32.totalorder %s31_s19, %s504_s27  ;;  %p510_p5 = scmp.lt.s32.totalorder %s504_s27, %s504_s27 }
   0xc   :  { %p511_p6 = por %p510_p5, %p509_p4 }
   0xe   :  { %p512_p7 = pnand %p511_p6, %p505_p3 }
  0x10   :  { %515 = shalt.err (!%p512_p7)
}
  0x11   :  { %s589_s28 = smov 64   ;;  %s590_s29 = smov 4  }
  0x12   :  { %36 = dma.hbm_to_vmem [thread:$0]  %s695_s1, 1024, %s31_s19, [#allocation6], %s589_s28, %s589_s28, %s590_s29  }
  0x13   :  { %s591_s7 = smov [#allocation2]   ;;  %s516_s11 = scalar_lea.hbm %s694_s0, 256 }
  0x14   :  { %s18_s8 = sshll.u32 %s591_s7, 4  ;;  %p517_p8 = scmp.ne.s32.totalorder %s694_s0, %s516_s11  ;;  %s19_s8 = int_to_ptr.vmem [resolvable:$true] %s18_s8 }
  0x15   :  { %p520_p9 = scmp.lt.u32.totalorder %s516_s11, %s694_s0 }
  0x17   :  { %p522_p10 = pnand %p520_p9, %p517_p8 }
  0x19   :  { %525 = shalt.err (!%p522_p10)
}
  0x1a   :  { %s526_s16 = scalar_lea.vmem %s19_s8, 256  ;;  %p531_p12 = scmp.lt.s32.totalorder %s19_s8, %s19_s8 }
  0x1b   :  { %p527_p11 = scmp.ne.s32.totalorder %s19_s8, %s526_s16  ;;  %p532_p13 = scmp.lt.s32.totalorder %s526_s16, %s526_s16 }
  0x1d   :  { %p533_p0 = por %p532_p13, %p531_p12 }
  0x1f   :  { %p534_p1 = pnand %p533_p0, %p527_p11 }
  0x21   :  { %537 = shalt.err (!%p534_p1)
}
  0x22   :  { %s592_s1 = smov 128   ;;  %s593_s17 = smov 8  }
  0x23   :  { %24 = dma.hbm_to_vmem [thread:$0]  %s694_s0, 256, %s19_s8, [#allocation3], %s592_s1, %s592_s1, %s593_s17  }
  0x24   :  { %s594_s20 = smov [#allocation7]   ;;  %s538_s24 = scalar_lea.hbm %s697_s3, 1024 }
  0x25   :  { %s44_s21 = sshll.u32 %s594_s20, 4  ;;  %p539_p2 = scmp.ne.s32.totalorder %s697_s3, %s538_s24  ;;  %s45_s21 = int_to_ptr.vmem [resolvable:$true] %s44_s21 }
  0x26   :  { %p542_p3 = scmp.lt.u32.totalorder %s538_s24, %s697_s3 }
  0x28   :  { %p544_p4 = pnand %p542_p3, %p539_p2 }
  0x2a   :  { %547 = shalt.err (!%p544_p4)
}
  0x2b   :  { %s548_s6 = scalar_lea.vmem %s45_s21, 1024  ;;  %p553_p6 = scmp.lt.s32.totalorder %s45_s21, %s45_s21 }
  0x2c   :  { %p549_p5 = scmp.ne.s32.totalorder %s45_s21, %s548_s6  ;;  %p554_p7 = scmp.lt.s32.totalorder %s548_s6, %s548_s6 }
  0x2e   :  { %p555_p8 = por %p554_p7, %p553_p6 }
  0x30   :  { %p556_p9 = pnand %p555_p8, %p549_p5 }
  0x32   :  { %559 = shalt.err (!%p556_p9)
}
  0x33   :  { %50 = dma.hbm_to_vmem [thread:$0]  %s697_s3, 1024, %s45_s21, [#allocation6], %s589_s28, %s589_s28, %s590_s29  }
  0x34   :  { %582 = dma.done.wait [#allocation3], 256  }
  0x35   :  { %583 = vsyncadd [#allocation3], 4294967040 }
  0x36   :  { %584 = dma.done.wait [#allocation6], 2048  }
  0x37   :  { %585 = vsyncadd [#allocation6], 4294965248  ;;  %v595_v0 = vmov 0.0   ;;  %vm596_vm0 = vmmov 0   ;;  %v470_v1 = vld [vmem:[#allocation5] sm:$0xff]   ;;  %v471_v2 = vld [vmem:[#allocation5 + $0x8] sm:$0xff]  }
  0x38   :  { %420 = vmatprep.subr.bf16.mxu0 %v595_v0  ;;  %436 = vmatprep.mubr.msk.bf16.mxu0 %vm596_vm0, %v595_v0  ;;  %v472_v3 = vld [vmem:[#allocation5 + $0x10] sm:$0xff]   ;;  %v473_v4 = vld [vmem:[#allocation5 + $0x18] sm:$0xff]   ;;  %v474_v5 = vld [vmem:[#allocation5 + $0x20] sm:$0xff]   ;;  %s597_s8 = smov [#allocation8]  }
  0x39   :  { %440 = vmatprep.subr.bf16.mxu1 %v595_v0  ;;  %456 = vmatprep.mubr.msk.bf16.mxu1 %vm596_vm0, %v595_v0  ;;  %v475_v6 = vld [vmem:[#allocation5 + $0x28] sm:$0xff]   ;;  %v476_v7 = vld [vmem:[#allocation5 + $0x30] sm:$0xff]   ;;  %v477_v8 = vld [vmem:[#allocation5 + $0x38] sm:$0xff]   ;;  %s371_s9 = sshll.u32 %s597_s8, 4  ;;  %s372_s9 = int_to_ptr.vmem [resolvable:$true] %s371_s9 }
  0x3a   :  { %421 = vmatpush3.bf16.msra.mxu0 %v470_v1  ;;  %v69_v9 = vld [vmem:[#allocation2] sm:$0xff]  ;;  %v70_v10 = vld [vmem:[#allocation2 + $0x8] sm:$0xff]  ;;  %v478_v12 = vld [vmem:[#allocation7] sm:$0xff]   ;;  %s560_s10 = scalar_lea.vmem %s372_s9, 256  ;;  %p565_p11 = scmp.lt.s32.totalorder %s372_s9, %s372_s9 }
  0x3b   :  { %422 = vmatprep.subr.bf16.mxu0 %v595_v0  ;;  %v71_v11 = vpack.c.bf16 %v70_v10, %v69_v9  ;;  %441 = vmatpush3.bf16.msra.mxu1 %v478_v12  ;;  %v479_v13 = vld [vmem:[#allocation7 + $0x8] sm:$0xff]   ;;  %v480_v14 = vld [vmem:[#allocation7 + $0x10] sm:$0xff]   ;;  %v481_v15 = vld [vmem:[#allocation7 + $0x18] sm:$0xff]   ;;  %p561_p10 = scmp.ne.s32.totalorder %s372_s9, %s560_s10  ;;  %p566_p12 = scmp.lt.s32.totalorder %s560_s10, %s560_s10 }
  0x3c   :  { %442 = vmatprep.subr.bf16.mxu1 %v595_v0  ;;  %v482_v16 = vld [vmem:[#allocation7 + $0x20] sm:$0xff]   ;;  %v483_v17 = vld [vmem:[#allocation7 + $0x28] sm:$0xff]   ;;  %v484_v18 = vld [vmem:[#allocation7 + $0x30] sm:$0xff]  }
  0x3d   :  { %v485_v19 = vld [vmem:[#allocation7 + $0x38] sm:$0xff]   ;;  %v384_v20 = vld [vmem:[%s696_s2] ss:$0 sm:$0xff]  ;;  %p567_p13 = por %p566_p12, %p565_p11 }
  0x3e   :  { %423 = vmatpush3.bf16.msra.mxu0 %v471_v2 }
  0x3f   :  { %424 = vmatprep.subr.bf16.mxu0 %v595_v0  ;;  %443 = vmatpush3.bf16.msra.mxu1 %v479_v13  ;;  %p568_p0 = pnand %p567_p13, %p561_p10 }
  0x40   :  { %444 = vmatprep.subr.bf16.mxu1 %v595_v0 }
  0x42   :  { %425 = vmatpush3.bf16.msra.mxu0 %v472_v3 }
  0x43   :  { %426 = vmatprep.subr.bf16.mxu0 %v595_v0  ;;  %445 = vmatpush3.bf16.msra.mxu1 %v480_v14 }
  0x44   :  { %446 = vmatprep.subr.bf16.mxu1 %v595_v0 }
  0x46   :  { %427 = vmatpush3.bf16.msra.mxu0 %v473_v4 }
  0x47   :  { %428 = vmatprep.subr.bf16.mxu0 %v595_v0  ;;  %447 = vmatpush3.bf16.msra.mxu1 %v481_v15  ;;  %v401_v15 = vld [vmem:[%s698_s4] ss:$0 sm:$0xff] }
  0x48   :  { %448 = vmatprep.subr.bf16.mxu1 %v595_v0 }
  0x4a   :  { %429 = vmatpush3.bf16.msra.mxu0 %v474_v5 }
  0x4b   :  { %430 = vmatprep.subr.bf16.mxu0 %v595_v0  ;;  %449 = vmatpush3.bf16.msra.mxu1 %v482_v16 }
  0x4c   :  { %450 = vmatprep.subr.bf16.mxu1 %v595_v0 }
  0x4e   :  { %431 = vmatpush3.bf16.msra.mxu0 %v475_v6 }
  0x4f   :  { %432 = vmatprep.subr.bf16.mxu0 %v595_v0  ;;  %451 = vmatpush3.bf16.msra.mxu1 %v483_v17 }
  0x50   :  { %452 = vmatprep.subr.bf16.mxu1 %v595_v0 }
  0x52   :  { %433 = vmatpush3.bf16.msra.mxu0 %v476_v7 }
  0x53   :  { %434 = vmatprep.subr.bf16.mxu0 %v595_v0  ;;  %453 = vmatpush3.bf16.msra.mxu1 %v484_v18 }
  0x54   :  { %454 = vmatprep.subr.bf16.mxu1 %v595_v0 }
  0x56   :  { %435 = vmatpush3.bf16.msra.mxu0 %v477_v8 }
  0x57   :  { %455 = vmatpush3.bf16.msra.mxu1 %v485_v19 }
  0x59   :  { %437 = vmatmul.mubr.bf16.vlgmr.msra.gmra.mrb[0].mxu0 %v71_v11 }
 0x12c   :  { %v177_v21 = vpop.f32.mrb[0].mxu0 }
 0x12d   :  { %v178_v22 = vadd.f32 %v384_v20, %v177_v21  ;;  %v438_v23 = vpop.f32.mrb[1].mxu0 }
 0x12e   :  { %v180_v24 = vpop.f32.mrb[2].mxu0 }
 0x12f   :  { %v186_v25 = vmul.f32 0.70710677, %v178_v22  ;;  %v181_v26 = vadd.f32 %v384_v20, %v180_v24  ;;  %v439_v27 = vpop.f32.mrb[3].mxu0  ;;  %v184_v8 = vmul.f32 0.5, %v178_v22 }
 0x131   :  { %v188_v28 = vand.u32 2147483647, %v186_v25  ;;  %v187_v29 = vmul.f32 0.70710677, %v181_v26  ;;  %vm228_vm1 = vcmp.ge.f32.partialorder %v186_v25, 0.0  ;;  %v185_v9 = vmul.f32 0.5, %v181_v26 }
 0x133   :  { %v190_v30 = vmul.f32 0.3275911, %v188_v28  ;;  %v189_v31 = vand.u32 2147483647, %v187_v29  ;;  %v216_v35 = vsub.f32 0.0, %v188_v28  ;;  %vm229_vm2 = vcmp.ge.f32.partialorder %v187_v29, 0.0 }
 0x135   :  { %v192_v32 = vadd.f32 1.0, %v190_v30  ;;  %v191_v33 = vmul.f32 0.3275911, %v189_v31  ;;  %v217_v36 = vsub.f32 0.0, %v189_v31  ;;  %v218_v38 = vmul.f32 %v216_v35, %v188_v28 }
 0x137   :  { %486 = vrcp.f32 %v192_v32  ;;  %v193_v34 = vadd.f32 1.0, %v191_v33  ;;  %v219_v42 = vmul.f32 %v217_v36, %v189_v31  ;;  %v220_v43 = vmul.f32 1.442695, %v218_v38 }
 0x139   :  { %488 = vrcp.f32 %v193_v34  ;;  %v222_v48 = vmul.f32 1.442695, %v219_v42 }
 0x13a   :  { %490 = vpow2.f32 %v220_v43 }
 0x13b   :  { %492 = vpow2.f32 %v222_v48 }
 0x141   :  { %v487_v37 = vpop.eup %486 }
 0x142   :  { %v198_v39 = vmul.f32 1.0614054, %v487_v37 }
 0x143   :  { %v489_v40 = vpop.eup %488 }
 0x144   :  { %v200_v41 = vadd.f32 -1.4531521, %v198_v39  ;;  %v199_v44 = vmul.f32 1.0614054, %v489_v40  ;;  %v491_v59 = vpop.eup %490 }
 0x145   :  { %v493_v63 = vpop.eup %492 }
 0x146   :  { %v202_v45 = vmul.f32 %v487_v37, %v200_v41  ;;  %v201_v46 = vadd.f32 -1.4531521, %v199_v44 }
 0x148   :  { %v204_v47 = vadd.f32 1.4214138, %v202_v45  ;;  %v203_v49 = vmul.f32 %v489_v40, %v201_v46 }
 0x14a   :  { %v206_v50 = vmul.f32 %v487_v37, %v204_v47  ;;  %v205_v51 = vadd.f32 1.4214138, %v203_v49 }
 0x14c   :  { %v208_v52 = vadd.f32 -0.28449672, %v206_v50  ;;  %v207_v53 = vmul.f32 %v489_v40, %v205_v51 }
 0x14e   :  { %v210_v54 = vmul.f32 %v487_v37, %v208_v52  ;;  %v209_v55 = vadd.f32 -0.28449672, %v207_v53 }
 0x150   :  { %v212_v56 = vadd.f32 0.2548296, %v210_v54  ;;  %v211_v57 = vmul.f32 %v489_v40, %v209_v55 }
 0x152   :  { %v214_v58 = vmul.f32 %v487_v37, %v212_v56  ;;  %v213_v60 = vadd.f32 0.2548296, %v211_v57 }
 0x154   :  { %v224_v61 = vmul.f32 %v491_v59, %v214_v58  ;;  %v215_v62 = vmul.f32 %v489_v40, %v213_v60 }
 0x156   :  { %v226_v0 = vsub.f32 1.0, %v224_v61  ;;  %v225_v1 = vmul.f32 %v493_v63, %v215_v62 }
 0x158   :  { %v230_v2 = vsub.f32 0.0, %v226_v0  ;;  %v227_v3 = vsub.f32 1.0, %v225_v1 }
 0x15a   :  { %v232_v4 = vsel %vm228_vm1, %v226_v0, %v230_v2  ;;  %v231_v5 = vsub.f32 0.0, %v227_v3 }
 0x15b   :  { %v234_v6 = vadd.f32 1.0, %v232_v4 }
 0x15c   :  { %v233_v7 = vsel %vm229_vm2, %v227_v3, %v231_v5 }
 0x15d   :  { %v235_v10 = vadd.f32 1.0, %v233_v7  ;;  %v236_v11 = vmul.f32 %v234_v6, %v184_v8 }
 0x15f   :  { %v237_v12 = vmul.f32 %v235_v10, %v185_v9 }
 0x161   :  { %v240_v13 = vpack.c.bf16 %v237_v12, %v236_v11 }
 0x163   :  { %457 = vmatmul.mubr.bf16.vlgmr.msra.gmra.mrb[0].mxu1 %v240_v13 }
 0x236   :  { %v339_v14 = vpop.f32.mrb[0].mxu1 }
 0x237   :  { %v458_v16 = vpop.f32.mrb[1].mxu1  ;;  %v362_v19 = vadd.f32 %v401_v15, %v339_v14 }
 0x238   :  { %v342_v17 = vpop.f32.mrb[2].mxu1 }
 0x239   :  { %v459_v18 = vpop.f32.mrb[3].mxu1  ;;  %v363_v20 = vadd.f32 %v401_v15, %v342_v17  ;;  %364 = vst [vmem:[#allocation8] sm:$0xff] %v362_v19 }
 0x23b   :  { %365 = vst [vmem:[#allocation8 + $0x8] sm:$0xff] %v363_v20 }
 0x23c   :  { %571 = shalt.err (!%p568_p0)
}
 0x23d   :  { %s572_s4 = scalar_lea.hbm %s699_s5, 256 }
 0x23e   :  { %p573_p1 = scmp.ne.s32.totalorder %s699_s5, %s572_s4  ;;  %p576_p2 = scmp.lt.u32.totalorder %s572_s4, %s699_s5 }
 0x240   :  { %p578_p3 = pnand %p576_p2, %p573_p1 }
 0x242   :  { %581 = shalt.err (!%p578_p3)
}
 0x243   :  { %377 = dma.vmem_to_hbm [thread:$0]  %s372_s9, 256, %s699_s5, [#allocation4], %s592_s1, %s592_s1, %s593_s17  }
 0x244   :  { %586 = dma.done.wait [#allocation4], 256  }
 0x245   :  { %587 = vsyncadd [#allocation4], 4294967040 }
 0x246   :  { %381 = vsyncpa [#allocation3], 1 }
 0x247   :  { %382 = vsyncpa [#allocation6], 1 }
 0x248   :  { %383 = vsyncpa [#allocation4], 1 }

</bundles_post_ra>
